<compile_context>
chip_gen: v5e
topology: v5e:2x2
jax: 0.10.0
libtpu: 0.0.40
codegen_flags: <defaults>
</compile_context>

<pallas_src>
import jax
import jax.numpy as jnp
import numpy as np
from jax import lax
from jax.experimental import pallas as pl
from jax.experimental.pallas import tpu as pltpu


# ----------------------------------------------------------------------------
# Single fused kernel: conv3x3 + ReLU + 2x2 max-pool + linear + softmax
# ----------------------------------------------------------------------------
def _cnn_fused_kernel(p_ref, wc_ref, bc_ref, oh_ref, wl_ref, g_ref, sel_ref, bl_ref, o_ref):
    # p_ref  : (4, R, 36)  im2col rows; slab w = pooling-window position (dy,dx),
    #                      rows ordered (n, h', w'), features ordered (kh, kw, cin)
    # wc_ref : (36, Cout)  conv weight (HWIO flattened)      bc_ref: (1, Cout)
    # oh_ref : (Cout, Cout*K)  0/1: broadcast each channel across the K class lanes
    # wl_ref : (R, Cout*K)     classifier weight per row, [row, c*K + k]
    # g_ref  : (Cout*K, K)     0/1: sum the Cout channel groups back to K lanes
    # sel_ref: (N, R)          0/1: sum the spatial rows belonging to each sample
    # bl_ref : (1, K)          o_ref: (N, K)

    # ---- conv as a single K=36 contraction per window slab, fused with the 2x2 max ----
    z = jnp.dot(p_ref[0], wc_ref[...], preferred_element_type=jnp.float32)
    for w in range(1, p_ref.shape[0]):
        z = jnp.maximum(z, jnp.dot(p_ref[w], wc_ref[...], preferred_element_type=jnp.float32))
    # bias-add and ReLU commute with the window max (same bias for all 4 window taps)
    pooled = jnp.maximum(z + bc_ref[...], 0.0)                                    # (R, Cout)

    # ---- linear over the PyTorch-flattened (c, h', w') features ----
    # The flatten mixes the row axis (h', w') with the lane axis (c); rather than an
    # in-kernel reshape/transpose we keep everything as plain 2D matmuls / elementwise:
    y = jnp.dot(pooled, oh_ref[...], preferred_element_type=jnp.float32) * wl_ref[...]  # (R, Cout*K)
    u = jnp.dot(sel_ref[...], y, preferred_element_type=jnp.float32)                    # (N, Cout*K)
    logits = jnp.dot(u, g_ref[...], preferred_element_type=jnp.float32) + bl_ref[...]   # (N, K)

    # ---- numerically stable softmax (dim=1); reciprocal on the otherwise-idle EUP ----
    m = jnp.max(logits, axis=-1, keepdims=True)
    e = jnp.exp(logits - m)
    o_ref[...] = e * pl.reciprocal(jnp.sum(e, axis=-1, keepdims=True), approx=True)


# ----------------------------------------------------------------------------
# Wrapper: one-time layout prep (tiny XLA glue) + the single pallas_call
# ----------------------------------------------------------------------------
@jax.jit
def cnn_forward(x_nchw, conv_w_hwio, conv_b, lin_w, lin_b):
    N, Cin, H, W = x_nchw.shape
    KH, KW, _, Cout = conv_w_hwio.shape
    Kcls = lin_w.shape[0]
    Hp, Wp = H // 2, W // 2
    S = Hp * Wp                      # spatial positions after pooling (64)
    R = N * S                        # rows processed by the kernel (128)
    Fk = KH * KW * Cin               # im2col features per pixel (36)

    # -- im2col patches, grouped by 2x2-pooling-window position (glue on a 4 KB input) --
    x_nhwc = jnp.transpose(x_nchw, (0, 2, 3, 1))
    x_pad = jnp.pad(x_nhwc, ((0, 0), (KH // 2, KH // 2), (KW // 2, KW // 2), (0, 0)))
    taps = [x_pad[:, kh:kh + H, kw:kw + W, :] for kh in range(KH) for kw in range(KW)]
    pat = jnp.stack(taps, axis=-2)                         # (N, H, W, KH*KW, Cin)
    pat = pat.reshape(N, Hp, 2, Wp, 2, Fk)                 # (n, h', dy, w', dx, f)
    pat = jnp.transpose(pat, (2, 4, 0, 1, 3, 5))           # (dy, dx, n, h', w', f)
    patches = pat.reshape(4, R, Fk)                        # (4, 128, 36); row = n*S + h'*Wp + w'

    # -- weights, reordered once so the kernel needs no layout shuffles --
    wc = conv_w_hwio.reshape(Fk, Cout)                     # (36, 8)
    bc = conv_b.reshape(1, Cout)                           # (1, 8)
    # classifier weight per kernel row: wl[n*S + s, c*K + k] = lin_w[k, c*S + s]
    wl = jnp.transpose(lin_w.reshape(Kcls, Cout, S), (2, 1, 0)).reshape(S, Cout * Kcls)
    wl = jnp.tile(wl, (N, 1))                              # (128, 80)
    bl = lin_b.reshape(1, Kcls)                            # (1, 10)

    # -- constant 0/1 helper matrices (implement the NCHW flatten on the MXU) --
    oh = jnp.asarray(np.kron(np.eye(Cout, dtype=np.float32),
                             np.ones((1, Kcls), np.float32)))          # (8, 80)
    g = jnp.asarray(np.tile(np.eye(Kcls, dtype=np.float32), (Cout, 1)))  # (80, 10)
    sel = jnp.asarray(np.kron(np.eye(N, dtype=np.float32),
                              np.ones((1, S), np.float32)))            # (2, 128)

    return pl.pallas_call(
        _cnn_fused_kernel,
        out_shape=jax.ShapeDtypeStruct((N, Kcls), jnp.float32),
        in_specs=[pl.BlockSpec(memory_space=pltpu.MemorySpace.VMEM)] * 8,
        out_specs=pl.BlockSpec(memory_space=pltpu.MemorySpace.VMEM),
    )(patches, wc, bc, oh, wl, g, sel, bl)


# ----------------------------------------------------------------------------
# Pure-JAX reference (mirrors the PyTorch module exactly)
# ----------------------------------------------------------------------------
def cnn_reference(x_nchw, conv_w_hwio, conv_b, lin_w, lin_b):
    y = lax.conv_general_dilated(
        x_nchw, conv_w_hwio, window_strides=(1, 1), padding="SAME",
        dimension_numbers=("NCHW", "HWIO", "NCHW"))
    y = jnp.maximum(y + conv_b[None, :, None, None], 0.0)
    y = lax.reduce_window(y, -jnp.inf, lax.max, (1, 1, 2, 2), (1, 1, 2, 2), "VALID")
    y = y.reshape(y.shape[0], -1)                          # PyTorch y.view(-1, n) (NCHW order)
    logits = y @ lin_w.T + lin_b
    return jax.nn.softmax(logits, axis=1)                  # F.softmax default dim=1 for 2D


if __name__ == "__main__":
    N, Cin, H, W = 2, 4, 16, 16
    Cout, KH, KW = 8, 3, 3
    num_classes = 10
    Fin = Cout * (H // 2) * (W // 2)                       # 8 * 8 * 8 = 512

    key = jax.random.PRNGKey(0)
    k_x, k_cw, k_cb, k_lw, k_lb = jax.random.split(key, 5)

    x = jax.random.normal(k_x, (N, Cin, H, W), dtype=jnp.float32)
    conv_w = 0.1 * jax.random.normal(k_cw, (KH, KW, Cin, Cout), dtype=jnp.float32)   # HWIO
    conv_b = 0.1 * jax.random.normal(k_cb, (Cout,), dtype=jnp.float32)
    lin_w = 0.05 * jax.random.normal(k_lw, (num_classes, Fin), dtype=jnp.float32)    # PyTorch (out, in)
    lin_b = 0.05 * jax.random.normal(k_lb, (num_classes,), dtype=jnp.float32)

    out = jax.block_until_ready(cnn_forward(x, conv_w, conv_b, lin_w, lin_b))
    ref = cnn_reference(x, conv_w, conv_b, lin_w, lin_b)

    # tolerance loosened slightly because of pl.reciprocal(approx=True) in the softmax
    np.testing.assert_allclose(np.asarray(out), np.asarray(ref), rtol=5e-3, atol=1e-5)
    assert out.shape == (N, num_classes)
    np.testing.assert_allclose(np.asarray(out).sum(axis=1), np.ones(N), rtol=0, atol=5e-3)

    print("KERNEL_OK")
</pallas_src>

<mosaic_0001>
module attributes {stable_mosaic.version = 11 : i64} {
  func.func @_cnn_fused_kernel(%arg0: memref<4x128x36xf32, #tpu.memory_space<vmem>>, %arg1: memref<36x8xf32, #tpu.memory_space<vmem>>, %arg2: memref<1x8xf32, #tpu.memory_space<vmem>>, %arg3: memref<8x80xf32, #tpu.memory_space<vmem>>, %arg4: memref<128x80xf32, #tpu.memory_space<vmem>>, %arg5: memref<80x10xf32, #tpu.memory_space<vmem>>, %arg6: memref<2x128xf32, #tpu.memory_space<vmem>>, %arg7: memref<1x10xf32, #tpu.memory_space<vmem>>, %arg8: memref<2x10xf32, #tpu.memory_space<vmem>>) attributes {dimension_semantics = [], scalar_prefetch = 0 : i64, scratch_operands = 0 : i64, tpu.core_type = #tpu.core_type<tc>} {
    %c0 = arith.constant 0 : index
    %c0_0 = arith.constant 0 : index
    %c0_1 = arith.constant 0 : index
    %0 = vector.load %arg0[%c0, %c0_0, %c0_1] : memref<4x128x36xf32, #tpu.memory_space<vmem>>, vector<1x128x36xf32>
    %1 = vector.shape_cast %0 : vector<1x128x36xf32> to vector<128x36xf32>
    %c0_2 = arith.constant 0 : index
    %c0_3 = arith.constant 0 : index
    %2 = vector.load %arg1[%c0_2, %c0_3] : memref<36x8xf32, #tpu.memory_space<vmem>>, vector<36x8xf32>
    %cst = arith.constant dense<0.000000e+00> : vector<128x8xf32>
    %3 = tpu.matmul %1, %2, %cst {dimension_numbers = #tpu.dot_dimension_numbers<[1], [0], [0], [1], [0, 0, 1, 1], [], []>} : vector<128x36xf32>, vector<36x8xf32>, vector<128x8xf32> -> vector<128x8xf32>
    %c1 = arith.constant 1 : index
    %c0_4 = arith.constant 0 : index
    %c0_5 = arith.constant 0 : index
    %4 = vector.load %arg0[%c1, %c0_4, %c0_5] : memref<4x128x36xf32, #tpu.memory_space<vmem>>, vector<1x128x36xf32>
    %5 = vector.shape_cast %4 : vector<1x128x36xf32> to vector<128x36xf32>
    %c0_6 = arith.constant 0 : index
    %c0_7 = arith.constant 0 : index
    %6 = vector.load %arg1[%c0_6, %c0_7] : memref<36x8xf32, #tpu.memory_space<vmem>>, vector<36x8xf32>
    %cst_8 = arith.constant dense<0.000000e+00> : vector<128x8xf32>
    %7 = tpu.matmul %5, %6, %cst_8 {dimension_numbers = #tpu.dot_dimension_numbers<[1], [0], [0], [1], [0, 0, 1, 1], [], []>} : vector<128x36xf32>, vector<36x8xf32>, vector<128x8xf32> -> vector<128x8xf32>
    %8 = arith.maximumf %3, %7 : vector<128x8xf32>
    %c2 = arith.constant 2 : index
    %c0_9 = arith.constant 0 : index
    %c0_10 = arith.constant 0 : index
    %9 = vector.load %arg0[%c2, %c0_9, %c0_10] : memref<4x128x36xf32, #tpu.memory_space<vmem>>, vector<1x128x36xf32>
    %10 = vector.shape_cast %9 : vector<1x128x36xf32> to vector<128x36xf32>
    %c0_11 = arith.constant 0 : index
    %c0_12 = arith.constant 0 : index
    %11 = vector.load %arg1[%c0_11, %c0_12] : memref<36x8xf32, #tpu.memory_space<vmem>>, vector<36x8xf32>
    %cst_13 = arith.constant dense<0.000000e+00> : vector<128x8xf32>
    %12 = tpu.matmul %10, %11, %cst_13 {dimension_numbers = #tpu.dot_dimension_numbers<[1], [0], [0], [1], [0, 0, 1, 1], [], []>} : vector<128x36xf32>, vector<36x8xf32>, vector<128x8xf32> -> vector<128x8xf32>
    %13 = arith.maximumf %8, %12 : vector<128x8xf32>
    %c3 = arith.constant 3 : index
    %c0_14 = arith.constant 0 : index
    %c0_15 = arith.constant 0 : index
    %14 = vector.load %arg0[%c3, %c0_14, %c0_15] : memref<4x128x36xf32, #tpu.memory_space<vmem>>, vector<1x128x36xf32>
    %15 = vector.shape_cast %14 : vector<1x128x36xf32> to vector<128x36xf32>
    %c0_16 = arith.constant 0 : index
    %c0_17 = arith.constant 0 : index
    %16 = vector.load %arg1[%c0_16, %c0_17] : memref<36x8xf32, #tpu.memory_space<vmem>>, vector<36x8xf32>
    %cst_18 = arith.constant dense<0.000000e+00> : vector<128x8xf32>
    %17 = tpu.matmul %15, %16, %cst_18 {dimension_numbers = #tpu.dot_dimension_numbers<[1], [0], [0], [1], [0, 0, 1, 1], [], []>} : vector<128x36xf32>, vector<36x8xf32>, vector<128x8xf32> -> vector<128x8xf32>
    %18 = arith.maximumf %13, %17 : vector<128x8xf32>
    %c0_19 = arith.constant 0 : index
    %c0_20 = arith.constant 0 : index
    %19 = vector.load %arg2[%c0_19, %c0_20] : memref<1x8xf32, #tpu.memory_space<vmem>>, vector<1x8xf32>
    %20 = vector.broadcast %19 : vector<1x8xf32> to vector<128x8xf32>
    %21 = arith.addf %18, %20 : vector<128x8xf32>
    %cst_21 = arith.constant 0.000000e+00 : f32
    %22 = vector.broadcast %cst_21 : f32 to vector<128x8xf32>
    %23 = arith.maximumf %21, %22 : vector<128x8xf32>
    %c0_22 = arith.constant 0 : index
    %c0_23 = arith.constant 0 : index
    %24 = vector.load %arg3[%c0_22, %c0_23] : memref<8x80xf32, #tpu.memory_space<vmem>>, vector<8x80xf32>
    %cst_24 = arith.constant dense<0.000000e+00> : vector<128x80xf32>
    %25 = tpu.matmul %23, %24, %cst_24 {dimension_numbers = #tpu.dot_dimension_numbers<[1], [0], [0], [1], [0, 0, 1, 1], [], []>} : vector<128x8xf32>, vector<8x80xf32>, vector<128x80xf32> -> vector<128x80xf32>
    %c0_25 = arith.constant 0 : index
    %c0_26 = arith.constant 0 : index
    %26 = vector.load %arg4[%c0_25, %c0_26] : memref<128x80xf32, #tpu.memory_space<vmem>>, vector<128x80xf32>
    %27 = arith.mulf %25, %26 : vector<128x80xf32>
    %c0_27 = arith.constant 0 : index
    %c0_28 = arith.constant 0 : index
    %28 = vector.load %arg6[%c0_27, %c0_28] : memref<2x128xf32, #tpu.memory_space<vmem>>, vector<2x128xf32>
    %cst_29 = arith.constant dense<0.000000e+00> : vector<2x80xf32>
    %29 = tpu.matmul %28, %27, %cst_29 {dimension_numbers = #tpu.dot_dimension_numbers<[1], [0], [0], [1], [0, 0, 1, 1], [], []>} : vector<2x128xf32>, vector<128x80xf32>, vector<2x80xf32> -> vector<2x80xf32>
    %c0_30 = arith.constant 0 : index
    %c0_31 = arith.constant 0 : index
    %30 = vector.load %arg5[%c0_30, %c0_31] : memref<80x10xf32, #tpu.memory_space<vmem>>, vector<80x10xf32>
    %cst_32 = arith.constant dense<0.000000e+00> : vector<2x10xf32>
    %31 = tpu.matmul %29, %30, %cst_32 {dimension_numbers = #tpu.dot_dimension_numbers<[1], [0], [0], [1], [0, 0, 1, 1], [], []>} : vector<2x80xf32>, vector<80x10xf32>, vector<2x10xf32> -> vector<2x10xf32>
    %c0_33 = arith.constant 0 : index
    %c0_34 = arith.constant 0 : index
    %32 = vector.load %arg7[%c0_33, %c0_34] : memref<1x10xf32, #tpu.memory_space<vmem>>, vector<1x10xf32>
    %33 = vector.broadcast %32 : vector<1x10xf32> to vector<2x10xf32>
    %34 = arith.addf %31, %33 : vector<2x10xf32>
    %cst_35 = arith.constant dense<0xFF800000> : vector<2xf32>
    %35 = vector.multi_reduction <maximumf>, %34, %cst_35 [1] : vector<2x10xf32> to vector<2xf32>
    %36 = vector.shape_cast %35 : vector<2xf32> to vector<2x1xf32>
    %37 = vector.broadcast %36 : vector<2x1xf32> to vector<2x10xf32>
    %38 = arith.subf %34, %37 : vector<2x10xf32>
    %39 = math.exp %38 : vector<2x10xf32>
    %cst_36 = arith.constant dense<0.000000e+00> : vector<2xf32>
    %40 = vector.multi_reduction <add>, %39, %cst_36 [1] : vector<2x10xf32> to vector<2xf32>
    %41 = vector.shape_cast %40 : vector<2xf32> to vector<2x1xf32>
    %42 = tpu.reciprocal %41 {approx = true} : vector<2x1xf32> -> vector<2x1xf32>
    %43 = vector.broadcast %42 : vector<2x1xf32> to vector<2x10xf32>
    %44 = arith.mulf %39, %43 : vector<2x10xf32>
    %c0_37 = arith.constant 0 : index
    %c0_38 = arith.constant 0 : index
    %45 = vector.load %arg8[%c0_37, %c0_38] : memref<2x10xf32, #tpu.memory_space<vmem>>, vector<2x10xf32>
    tpu.vector_store %arg8[%c0_37, %c0_38], %44 {strides = array<i32>} : memref<2x10xf32, #tpu.memory_space<vmem>>, vector<2x10xf32>,
    return
  }
}

</mosaic_0001>

<bundles_post_ra>
// kernel: cnn_forward.1
= control target key start
LH: loop header
LB: loop body
LE: loop exit
PB: predicated region body
PF: predicated region fallthrough
CT: control target
= control target key end

     0   :  { %vm100_vm0 = vcmask 1043456   ;;  %s1561_s0 = inlined_call_operand.vmem [shape: f32[4,128,36], index: 0, kind: input, shape index: {}]   ;;  %s1562_s1 = inlined_call_operand.vmem [shape: f32[36,8], index: 1, kind: input, shape index: {}]   ;;  %s1563_s2 = inlined_call_operand.vmem [shape: f32[1,8], index: 2, kind: input, shape index: {}]   ;;  %s1564_s3 = inlined_call_operand.vmem [shape: f32[8,80], index: 3, kind: input, shape index: {}]   ;;  %s1565_s4 = inlined_call_operand.vmem [shape: f32[128,80], index: 4, kind: input, shape index: {}]   ;;  %s1566_s5 = inlined_call_operand.vmem [shape: f32[80,10], index: 5, kind: input, shape index: {}]   ;;  %s1567_s6 = inlined_call_operand.vmem [shape: f32[2,128], index: 6, kind: input, shape index: {}]   ;;  %s1568_s7 = inlined_call_operand.vmem [shape: f32[1,10], index: 7, kind: input, shape index: {}]   ;;  %s1569_s8 = inlined_call_operand.hbm [shape: f32[2,10], index: 8, kind: output, shape index: {}]  }
   0x1   :  { %v50_v0 = vld [vmem:[%s1562_s1 + $0x20] sm:$0xf]  ;;  %v49_v1 = vld [vmem:[%s1562_s1 + $0x18] sm:$0xff]  ;;  %v48_v2 = vld [vmem:[%s1562_s1 + $0x10] sm:$0xff] }
   0x2   :  { %1011 = vmatpush.msk.msra.mxu1 %vm100_vm0, %v50_v0  ;;  %1012 = vmatpush.msk.msra.mxu2 %vm100_vm0, %v50_v0  ;;  %v47_v3 = vld [vmem:[%s1562_s1 + $0x8] sm:$0xff]  ;;  %v46_v4 = vld [vmem:[%s1562_s1] sm:$0xff] }
   0x3   :  { %1013 = vmatpush.msk.msra.mxu3 %vm100_vm0, %v50_v0  ;;  %878 = vmatpush.msk.msra.mxu0 %vm100_vm0, %v50_v0 }
   0x4   :  { %1014 = vmatpush.msra.mxu1 %v49_v1  ;;  %1015 = vmatpush.msra.mxu2 %v49_v1 }
   0x5   :  { %1016 = vmatpush.msra.mxu3 %v49_v1  ;;  %116 = vmatpush.msra.mxu0 %v49_v1 }
   0x6   :  { %1017 = vmatpush.msra.mxu1 %v48_v2  ;;  %1018 = vmatpush.msra.mxu2 %v48_v2 }
   0x7   :  { %1019 = vmatpush.msra.mxu3 %v48_v2  ;;  %117 = vmatpush.msra.mxu0 %v48_v2 }
   0x8   :  { %13 = vsyncpa [#allocation3], 0  ;;  %1020 = vmatpush.msra.mxu1 %v47_v3  ;;  %1021 = vmatpush.msra.mxu2 %v47_v3  ;;  %v35_v5 = vld [vmem:[%s1561_s0 + $0x28] sm:$0xff]  ;;  %vm51_vm1 = vcmask 293888   ;;  %v37_v6 = vld [vmem:[%s1561_s0 + $0x38] sm:$0xff]  ;;  %vm644_vm2 = vcmask 64512  }
   0x9   :  { %1022 = vmatpush.msra.mxu3 %v47_v3  ;;  %v41_v7 = vld [vmem:[%s1561_s0 + $0x58] sm:$0xff]  ;;  %118 = vmatpush.msra.mxu0 %v47_v3  ;;  %v36_v8 = vld [vmem:[%s1561_s0 + $0x30] sm:$0xff]  ;;  %v38_v9 = vld [vmem:[%s1561_s0 + $0x40] sm:$0xff]  ;;  %vm825_vm3 = vcmask 654336   ;;  %vm849_vm4 = vcmask 74752   ;;  %s869_s10 = sshll.u32 %s1569_s8, 4  ;;  %s870_s10 = int_to_ptr.hbm [resolvable:$true] %s869_s10 }
   0xa   :  { %1023 = vmatpush.msra.mxu1 %v46_v4  ;;  %1024 = vmatpush.msra.mxu2 %v46_v4  ;;  %v42_v10 = vld [vmem:[%s1561_s0 + $0x60] sm:$0xff]  ;;  %v39_v13 = vld [vmem:[%s1561_s0 + $0x48] sm:$0xff]  ;;  %v40_v17 = vld [vmem:[%s1561_s0 + $0x50] sm:$0xff] }
   0xb   :  { %1025 = vmatpush.msra.mxu3 %v46_v4  ;;  %884 = vmatmul.msk.f32.vlgmr.msra.gmra.mxu1 %vm51_vm1, %v35_v5  ;;  %v30_v11 = vld [vmem:[%s1561_s0] sm:$0xff]  ;;  %v43_v14 = vld [vmem:[%s1561_s0 + $0x68] sm:$0xff]  ;;  %v44_v18 = vld [vmem:[%s1561_s0 + $0x70] sm:$0xff] }
   0xc   :  { %886 = vmatmul.msk.f32.vlgmr.msra.gmra.mxu2 %vm51_vm1, %v37_v6  ;;  %890 = vmatmul.msk.f32.vlgmr.msra.gmra.mxu3 %vm51_vm1, %v41_v7  ;;  %v895_v12 = vld [vmem:[%s1561_s0 + $0x80] sm:$0xff]  ;;  %v31_v15 = vld [vmem:[%s1561_s0 + $0x8] sm:$0xff]  ;;  %v32_v19 = vld [vmem:[%s1561_s0 + $0x10] sm:$0xff] }
   0xd   :  { %911 = vmatpush.msk.msrb.mxu1 %vm100_vm0, %v50_v0  ;;  %944 = vmatpush.msk.msrb.mxu2 %vm100_vm0, %v50_v0  ;;  %v896_v16 = vld [vmem:[%s1561_s0 + $0x88] sm:$0xff]  ;;  %v897_v20 = vld [vmem:[%s1561_s0 + $0x90] sm:$0xff]  ;;  %v45_v21 = vld [vmem:[%s1561_s0 + $0x78] sm:$0xff] }
   0xe   :  { %977 = vmatpush.msk.msrb.mxu3 %vm100_vm0, %v50_v0  ;;  %119 = vmatpush.msra.mxu0 %v46_v4  ;;  %v928_v22 = vld [vmem:[%s1561_s0 + $0x100] sm:$0xff]  ;;  %v33_v23 = vld [vmem:[%s1561_s0 + $0x18] sm:$0xff]  ;;  %v929_v25 = vld [vmem:[%s1561_s0 + $0x108] sm:$0xff] }
   0xf   :  { %246 = vmatpush.msrb.mxu1 %v49_v1  ;;  %392 = vmatpush.msrb.mxu2 %v49_v1  ;;  %v898_v24 = vld [vmem:[%s1561_s0 + $0x98] sm:$0xff]  ;;  %v961_v26 = vld [vmem:[%s1561_s0 + $0x180] sm:$0xff]  ;;  %v930_v29 = vld [vmem:[%s1561_s0 + $0x110] sm:$0xff] }
  0x10   :  { %538 = vmatpush.msrb.mxu3 %v49_v1  ;;  %879 = vmatmul.msk.f32.vlgmr.msra.gmra.mxu0 %vm51_vm1, %v30_v11  ;;  %v34_v27 = vld [vmem:[%s1561_s0 + $0x20] sm:$0xff]  ;;  %v962_v30 = vld [vmem:[%s1561_s0 + $0x188] sm:$0xff]  ;;  %v931_v32 = vld [vmem:[%s1561_s0 + $0x118] sm:$0xff] }
  0x11   :  { %247 = vmatpush.msrb.mxu1 %v48_v2  ;;  %393 = vmatpush.msrb.mxu2 %v48_v2  ;;  %v899_v28 = vld [vmem:[%s1561_s0 + $0xa0] sm:$0xff]  ;;  %v900_v31 = vld [vmem:[%s1561_s0 + $0xa8] sm:$0xff]  ;;  %v963_v33 = vld [vmem:[%s1561_s0 + $0x190] sm:$0xff] }
  0x12   :  { %539 = vmatpush.msrb.mxu3 %v48_v2  ;;  %v901_v34 = vld [vmem:[%s1561_s0 + $0xb0] sm:$0xff]  ;;  %v932_v35 = vld [vmem:[%s1561_s0 + $0x120] sm:$0xff]  ;;  %v964_v36 = vld [vmem:[%s1561_s0 + $0x198] sm:$0xff] }
  0x13   :  { %885 = vmatmul.msk.f32.gmra.mxu1 %vm51_vm1, %v36_v8  ;;  %394 = vmatpush.msrb.mxu2 %v47_v3  ;;  %v902_v37 = vld [vmem:[%s1561_s0 + $0xb8] sm:$0xff]  ;;  %v933_v38 = vld [vmem:[%s1561_s0 + $0x128] sm:$0xff]  ;;  %v965_v39 = vld [vmem:[%s1561_s0 + $0x1a0] sm:$0xff] }
  0x14   :  { %887 = vmatmul.msk.f32.gmra.mxu2 %vm51_vm1, %v38_v9  ;;  %891 = vmatmul.msk.f32.gmra.mxu3 %vm51_vm1, %v42_v10  ;;  %v903_v40 = vld [vmem:[%s1561_s0 + $0xc0] sm:$0xff]  ;;  %v934_v41 = vld [vmem:[%s1561_s0 + $0x130] sm:$0xff]  ;;  %v966_v42 = vld [vmem:[%s1561_s0 + $0x1a8] sm:$0xff] }
  0x15   :  { %248 = vmatpush.msrb.mxu1 %v47_v3  ;;  %395 = vmatpush.msrb.mxu2 %v46_v4  ;;  %v904_v43 = vld [vmem:[%s1561_s0 + $0xc8] sm:$0xff]  ;;  %v935_v44 = vld [vmem:[%s1561_s0 + $0x138] sm:$0xff]  ;;  %v967_v45 = vld [vmem:[%s1561_s0 + $0x1b0] sm:$0xff] }
  0x16   :  { %540 = vmatpush.msrb.mxu3 %v47_v3  ;;  %v905_v46 = vld [vmem:[%s1561_s0 + $0xd0] sm:$0xff]  ;;  %v936_v47 = vld [vmem:[%s1561_s0 + $0x140] sm:$0xff]  ;;  %v968_v48 = vld [vmem:[%s1561_s0 + $0x1b8] sm:$0xff] }
  0x17   :  { %249 = vmatpush.msrb.mxu1 %v46_v4  ;;  %v906_v49 = vld [vmem:[%s1561_s0 + $0xd8] sm:$0xff]  ;;  %v937_v50 = vld [vmem:[%s1561_s0 + $0x148] sm:$0xff]  ;;  %v969_v51 = vld [vmem:[%s1561_s0 + $0x1c0] sm:$0xff] }
  0x18   :  { %541 = vmatpush.msrb.mxu3 %v46_v4  ;;  %880 = vmatmul.msk.f32.gmra.mxu0 %vm51_vm1, %v31_v15  ;;  %v907_v52 = vld [vmem:[%s1561_s0 + $0xe0] sm:$0xff]  ;;  %v938_v53 = vld [vmem:[%s1561_s0 + $0x150] sm:$0xff]  ;;  %v970_v54 = vld [vmem:[%s1561_s0 + $0x1c8] sm:$0xff] }
  0x19   :  { %v908_v55 = vld [vmem:[%s1561_s0 + $0xe8] sm:$0xff]  ;;  %v939_v56 = vld [vmem:[%s1561_s0 + $0x158] sm:$0xff]  ;;  %v971_v57 = vld [vmem:[%s1561_s0 + $0x1d0] sm:$0xff] }
  0x1a   :  { %v909_v59 = vld [vmem:[%s1561_s0 + $0xf0] sm:$0xff]  ;;  %v940_v60 = vld [vmem:[%s1561_s0 + $0x160] sm:$0xff]  ;;  %v972_v61 = vld [vmem:[%s1561_s0 + $0x1d8] sm:$0xff] }
  0x1b   :  { %912 = vmatmul.msk.f32.vlgmr.msrb.gmra.mxu1 %vm51_vm1, %v895_v12  ;;  %v910_v1 = vld [vmem:[%s1561_s0 + $0xf8] sm:$0xff]  ;;  %v941_v2 = vld [vmem:[%s1561_s0 + $0x168] sm:$0xff]  ;;  %v973_v3 = vld [vmem:[%s1561_s0 + $0x1e0] sm:$0xff] }
  0x1c   :  { %888 = vmatmul.msk.f32.gmra.mxu2 %vm51_vm1, %v39_v13  ;;  %892 = vmatmul.msk.f32.gmra.mxu3 %vm51_vm1, %v43_v14  ;;  %v942_v7 = vld [vmem:[%s1561_s0 + $0x170] sm:$0xff]  ;;  %v974_v8 = vld [vmem:[%s1561_s0 + $0x1e8] sm:$0xff]  ;;  %v643_v9 = vld [vmem:[%s1564_s3] sm:$0xff] }
  0x1d   :  { %708 = vmatpush.msrb.mxu0 %v643_v9  ;;  %v943_v13 = vld [vmem:[%s1561_s0 + $0x178] sm:$0xff]  ;;  %v975_v14 = vld [vmem:[%s1561_s0 + $0x1f0] sm:$0xff] }
  0x20   :  { %881 = vmatmul.msk.f32.gmra.mxu0 %vm51_vm1, %v32_v19  ;;  %v976_v19 = vld [vmem:[%s1561_s0 + $0x1f8] sm:$0xff] }
  0x23   :  { %913 = vmatmul.msk.f32.gmra.mxu1 %vm51_vm1, %v896_v16 }
  0x24   :  { %889 = vmatmul.msk.f32.gmra.mxu2 %vm51_vm1, %v40_v17  ;;  %893 = vmatmul.msk.f32.gmra.mxu3 %vm51_vm1, %v44_v18 }
  0x28   :  { %882 = vmatmul.msk.f32.gmra.mxu0 %vm51_vm1, %v33_v23 }
  0x2b   :  { %914 = vmatmul.msk.f32.gmra.mxu1 %vm51_vm1, %v897_v20 }
  0x2c   :  { %894 = vmatmul.msk.f32.gmra.mxu3 %vm51_vm1, %v45_v21  ;;  %945 = vmatmul.msk.f32.vlgmr.msrb.gmra.mxu2 %vm51_vm1, %v928_v22 }
  0x30   :  { %883 = vmatmul.msk.f32.gmra.mxu0 %vm51_vm1, %v34_v27 }
  0x33   :  { %915 = vmatmul.msk.f32.gmra.mxu1 %vm51_vm1, %v898_v24 }
  0x34   :  { %946 = vmatmul.msk.f32.gmra.mxu2 %vm51_vm1, %v929_v25  ;;  %978 = vmatmul.msk.f32.vlgmr.msrb.gmra.mxu3 %vm51_vm1, %v961_v26  ;;  %v1411_v26 = vld [vmem:[%s1563_s2] ss:$0 sm:$0xff] }
  0x3b   :  { %916 = vmatmul.msk.f32.gmra.mxu1 %vm51_vm1, %v899_v28 }
  0x3c   :  { %947 = vmatmul.msk.f32.gmra.mxu2 %vm51_vm1, %v930_v29  ;;  %979 = vmatmul.msk.f32.gmra.mxu3 %vm51_vm1, %v962_v30 }
  0x43   :  { %917 = vmatmul.msk.f32.gmra.mxu1 %vm51_vm1, %v900_v31 }
  0x44   :  { %948 = vmatmul.msk.f32.gmra.mxu2 %vm51_vm1, %v931_v32  ;;  %980 = vmatmul.msk.f32.gmra.mxu3 %vm51_vm1, %v963_v33 }
  0x4b   :  { %918 = vmatmul.msk.f32.gmra.mxu1 %vm51_vm1, %v901_v34 }
  0x4c   :  { %949 = vmatmul.msk.f32.gmra.mxu2 %vm51_vm1, %v932_v35  ;;  %981 = vmatmul.msk.f32.gmra.mxu3 %vm51_vm1, %v964_v36 }
  0x53   :  { %919 = vmatmul.msk.f32.gmra.mxu1 %vm51_vm1, %v902_v37 }
  0x54   :  { %950 = vmatmul.msk.f32.gmra.mxu2 %vm51_vm1, %v933_v38  ;;  %982 = vmatmul.msk.f32.gmra.mxu3 %vm51_vm1, %v965_v39 }
  0x5b   :  { %920 = vmatmul.msk.f32.gmra.mxu1 %vm51_vm1, %v903_v40 }
  0x5c   :  { %951 = vmatmul.msk.f32.gmra.mxu2 %vm51_vm1, %v934_v41  ;;  %983 = vmatmul.msk.f32.gmra.mxu3 %vm51_vm1, %v966_v42 }
  0x63   :  { %921 = vmatmul.msk.f32.gmra.mxu1 %vm51_vm1, %v904_v43 }
  0x64   :  { %952 = vmatmul.msk.f32.gmra.mxu2 %vm51_vm1, %v935_v44  ;;  %984 = vmatmul.msk.f32.gmra.mxu3 %vm51_vm1, %v967_v45 }
  0x6b   :  { %922 = vmatmul.msk.f32.gmra.mxu1 %vm51_vm1, %v905_v46 }
  0x6c   :  { %953 = vmatmul.msk.f32.gmra.mxu2 %vm51_vm1, %v936_v47  ;;  %985 = vmatmul.msk.f32.gmra.mxu3 %vm51_vm1, %v968_v48 }
  0x73   :  { %923 = vmatmul.msk.f32.gmra.mxu1 %vm51_vm1, %v906_v49 }
  0x74   :  { %954 = vmatmul.msk.f32.gmra.mxu2 %vm51_vm1, %v937_v50  ;;  %986 = vmatmul.msk.f32.gmra.mxu3 %vm51_vm1, %v969_v51 }
  0x7b   :  { %924 = vmatmul.msk.f32.gmra.mxu1 %vm51_vm1, %v907_v52 }
  0x7c   :  { %955 = vmatmul.msk.f32.gmra.mxu2 %vm51_vm1, %v938_v53  ;;  %987 = vmatmul.msk.f32.gmra.mxu3 %vm51_vm1, %v970_v54 }
  0x83   :  { %925 = vmatmul.msk.f32.gmra.mxu1 %vm51_vm1, %v908_v55 }
  0x84   :  { %956 = vmatmul.msk.f32.gmra.mxu2 %vm51_vm1, %v939_v56  ;;  %988 = vmatmul.msk.f32.gmra.mxu3 %vm51_vm1, %v971_v57 }
  0x88   :  { %v1339_v58 = vpop.f32.mrf.mxu1 }
  0x8b   :  { %926 = vmatmul.msk.f32.gmra.mxu1 %vm51_vm1, %v909_v59 }
  0x8c   :  { %957 = vmatmul.msk.f32.gmra.mxu2 %vm51_vm1, %v940_v60  ;;  %989 = vmatmul.msk.f32.gmra.mxu3 %vm51_vm1, %v972_v61 }
  0x8d   :  { %v121_v15 = vpop.f32.mrf.mxu0 }
  0x8f   :  { %v1353_v62 = vpop.f32.mrf.mxu2  ;;  %v1355_v63 = vpop.f32.mrf.mxu3 }
  0x90   :  { %v1357_v0 = vpop.f32.mrf.mxu1 }
  0x93   :  { %927 = vmatmul.msk.f32.gmra.mxu1 %vm51_vm1, %v910_v1 }
  0x94   :  { %958 = vmatmul.msk.f32.gmra.mxu2 %vm51_vm1, %v941_v2  ;;  %990 = vmatmul.msk.f32.gmra.mxu3 %vm51_vm1, %v973_v3 }
  0x95   :  { %v124_v20 = vpop.f32.mrf.mxu0 }
  0x97   :  { %v1371_v4 = vpop.f32.mrf.mxu2  ;;  %v1373_v5 = vpop.f32.mrf.mxu3 }
  0x98   :  { %v251_v6 = vpop.f32.mrf.mxu1 }
  0x99   :  { %v299_v24 = vmax.f32 %v121_v15, %v251_v6 }
  0x9c   :  { %959 = vmatmul.msk.f32.gmra.mxu2 %vm51_vm1, %v942_v7  ;;  %991 = vmatmul.msk.f32.gmra.mxu3 %vm51_vm1, %v974_v8 }
  0x9d   :  { %v127_v31 = vpop.f32.mrf.mxu0 }
  0x9f   :  { %v1386_v10 = vpop.f32.mrf.mxu2  ;;  %v1388_v11 = vpop.f32.mrf.mxu3 }
  0xa0   :  { %v254_v12 = vpop.f32.mrf.mxu1 }
  0xa1   :  { %v300_v30 = vmax.f32 %v124_v20, %v254_v12 }
  0xa4   :  { %960 = vmatmul.msk.f32.gmra.mxu2 %vm51_vm1, %v943_v13  ;;  %992 = vmatmul.msk.f32.gmra.mxu3 %vm51_vm1, %v975_v14 }
  0xa5   :  { %v130_v41 = vpop.f32.mrf.mxu0 }
  0xa7   :  { %v1398_v16 = vpop.f32.mrf.mxu2  ;;  %v1400_v17 = vpop.f32.mrf.mxu3 }
  0xa8   :  { %v257_v18 = vpop.f32.mrf.mxu1 }
  0xa9   :  { %v301_v39 = vmax.f32 %v127_v31, %v257_v18 }
  0xac   :  { %993 = vmatmul.msk.f32.gmra.mxu3 %vm51_vm1, %v976_v19 }
  0xad   :  { %v133_v52 = vpop.f32.mrf.mxu0 }
  0xaf   :  { %v1406_v21 = vpop.f32.mrf.mxu3  ;;  %v397_v22 = vpop.f32.mrf.mxu2 }
  0xb0   :  { %v260_v23 = vpop.f32.mrf.mxu1  ;;  %v445_v25 = vmax.f32 %v299_v24, %v397_v22 }
  0xb1   :  { %v302_v48 = vmax.f32 %v130_v41, %v260_v23 }
  0xb7   :  { %v400_v27 = vpop.f32.mrf.mxu2  ;;  %v543_v28 = vpop.f32.mrf.mxu3 }
  0xb8   :  { %v591_v29 = vmax.f32 %v445_v25, %v543_v28  ;;  %v263_v33 = vpop.f32.mrf.mxu1  ;;  %v446_v35 = vmax.f32 %v300_v30, %v400_v27 }
  0xb9   :  { %v303_v57 = vmax.f32 %v133_v52, %v263_v33 }
  0xba   :  { %v611_v32 = vadd.f32 %v1411_v26, %v591_v29 }
  0xbc   :  { %v627_v34 = vmax.f32 %v611_v32, 0.0 }
  0xbe   :  { %994 = vmatmul.msk.f32.vlgmr.msrb.gmra.mxu0 %vm644_vm2, %v627_v34 }
  0xbf   :  { %v403_v36 = vpop.f32.mrf.mxu2  ;;  %v546_v37 = vpop.f32.mrf.mxu3 }
  0xc0   :  { %v592_v38 = vmax.f32 %v446_v35, %v546_v37  ;;  %v266_v43 = vpop.f32.mrf.mxu1  ;;  %v447_v44 = vmax.f32 %v301_v39, %v403_v36 }
  0xc1   :  { %v304_v8 = vmax.f32 %v1339_v58, %v266_v43 }
  0xc2   :  { %v612_v40 = vadd.f32 %v1411_v26, %v592_v38 }
  0xc4   :  { %v628_v42 = vmax.f32 %v612_v40, 0.0 }
  0xc6   :  { %995 = vmatmul.msk.f32.gmra.mxu0 %vm644_vm2, %v628_v42 }
  0xc7   :  { %v406_v45 = vpop.f32.mrf.mxu2  ;;  %v549_v46 = vpop.f32.mrf.mxu3 }
  0xc8   :  { %v593_v47 = vmax.f32 %v447_v44, %v549_v46  ;;  %v448_v51 = vmax.f32 %v302_v48, %v406_v45  ;;  %v269_v53 = vpop.f32.mrf.mxu1 }
  0xc9   :  { %v305_v20 = vmax.f32 %v1357_v0, %v269_v53 }
  0xca   :  { %v613_v49 = vadd.f32 %v1411_v26, %v593_v47 }
  0xcc   :  { %v629_v50 = vmax.f32 %v613_v49, 0.0 }
  0xce   :  { %996 = vmatmul.msk.f32.gmra.mxu0 %vm644_vm2, %v629_v50 }
  0xcf   :  { %v409_v54 = vpop.f32.mrf.mxu2  ;;  %v552_v55 = vpop.f32.mrf.mxu3 }
  0xd0   :  { %v594_v56 = vmax.f32 %v448_v51, %v552_v55  ;;  %v449_v61 = vmax.f32 %v303_v57, %v409_v54  ;;  %v272_v3 = vpop.f32.mrf.mxu1 }
  0xd1   :  { %v306_v28 = vmax.f32 %v1353_v62, %v272_v3 }
  0xd2   :  { %v614_v59 = vadd.f32 %v1411_v26, %v594_v56 }
  0xd4   :  { %v630_v60 = vmax.f32 %v614_v59, 0.0 }
  0xd6   :  { %997 = vmatmul.msk.f32.gmra.mxu0 %vm644_vm2, %v630_v60 }
  0xd7   :  { %v412_v1 = vpop.f32.mrf.mxu2  ;;  %v555_v2 = vpop.f32.mrf.mxu3 }
  0xd8   :  { %v595_v6 = vmax.f32 %v449_v61, %v555_v2  ;;  %v450_v12 = vmax.f32 %v304_v8, %v412_v1  ;;  %v275_v18 = vpop.f32.mrf.mxu1 }
  0xd9   :  { %v307_v35 = vmax.f32 %v1371_v4, %v275_v18 }
  0xda   :  { %v615_v7 = vadd.f32 %v1411_v26, %v595_v6 }
  0xdc   :  { %v631_v9 = vmax.f32 %v615_v7, 0.0 }
  0xde   :  { %998 = vmatmul.msk.f32.gmra.mxu0 %vm644_vm2, %v631_v9 }
  0xdf   :  { %v415_v13 = vpop.f32.mrf.mxu2  ;;  %v558_v14 = vpop.f32.mrf.mxu3 }
  0xe0   :  { %v596_v15 = vmax.f32 %v450_v12, %v558_v14  ;;  %v451_v23 = vmax.f32 %v305_v20, %v415_v13  ;;  %v278_v29 = vpop.f32.mrf.mxu1 }
  0xe1   :  { %v308_v42 = vmax.f32 %v1386_v10, %v278_v29 }
  0xe2   :  { %v616_v19 = vadd.f32 %v1411_v26, %v596_v15 }
  0xe4   :  { %v632_v22 = vmax.f32 %v616_v19, 0.0 }
  0xe6   :  { %999 = vmatmul.msk.f32.gmra.mxu0 %vm644_vm2, %v632_v22 }
  0xe7   :  { %v418_v24 = vpop.f32.mrf.mxu2  ;;  %v561_v25 = vpop.f32.mrf.mxu3 }
  0xe8   :  { %v597_v27 = vmax.f32 %v451_v23, %v561_v25  ;;  %v452_v31 = vmax.f32 %v306_v28, %v418_v24  ;;  %v281_v37 = vpop.f32.mrf.mxu1 }
  0xe9   :  { %v309_v49 = vmax.f32 %v1398_v16, %v281_v37 }
  0xea   :  { %v617_v58 = vadd.f32 %v1411_v26, %v597_v27 }
  0xec   :  { %v633_v30 = vmax.f32 %v617_v58, 0.0 }
  0xee   :  { %1000 = vmatmul.msk.f32.gmra.mxu0 %vm644_vm2, %v633_v30 }
  0xef   :  { %v421_v32 = vpop.f32.mrf.mxu2  ;;  %v564_v33 = vpop.f32.mrf.mxu3 }
  0xf0   :  { %v598_v34 = vmax.f32 %v452_v31, %v564_v33  ;;  %v453_v38 = vmax.f32 %v307_v35, %v421_v32  ;;  %v284_v4 = vpop.f32.mrf.mxu1 }
  0xf1   :  { %v310_v56 = vmax.f32 %v1355_v63, %v284_v4  ;;  %v772_v4 = vld [vmem:[%s1565_s4 + $0x70] sm:$0xff] }
  0xf2   :  { %v618_v0 = vadd.f32 %v1411_v26, %v598_v34 }
  0xf4   :  { %v634_v36 = vmax.f32 %v618_v0, 0.0 }
  0xf6   :  { %1001 = vmatmul.msk.f32.gmra.mxu0 %vm644_vm2, %v634_v36 }
  0xf7   :  { %v424_v39 = vpop.f32.mrf.mxu2  ;;  %v567_v40 = vpop.f32.mrf.mxu3 }
  0xf8   :  { %v599_v62 = vmax.f32 %v453_v38, %v567_v40  ;;  %v454_v44 = vmax.f32 %v308_v42, %v424_v39  ;;  %v287_v55 = vpop.f32.mrf.mxu1 }
  0xf9   :  { %v311_v2 = vmax.f32 %v1373_v5, %v287_v55 }
  0xfa   :  { %v619_v41 = vadd.f32 %v1411_v26, %v599_v62 }
  0xfc   :  { %v635_v43 = vmax.f32 %v619_v41, 0.0 }
  0xfe   :  { %1002 = vmatmul.msk.f32.gmra.mxu0 %vm644_vm2, %v635_v43 }
  0xff   :  { %v427_v45 = vpop.f32.mrf.mxu2  ;;  %v570_v46 = vpop.f32.mrf.mxu3 }
 0x100   :  { %v600_v47 = vmax.f32 %v454_v44, %v570_v46  ;;  %v455_v51 = vmax.f32 %v309_v49, %v427_v45  ;;  %v290_v6 = vpop.f32.mrf.mxu1 }
 0x101   :  { %v312_v13 = vmax.f32 %v1388_v11, %v290_v6  ;;  %v766_v6 = vld [vmem:[%s1565_s4 + $0x40] sm:$0xff] }
 0x102   :  { %v620_v48 = vadd.f32 %v1411_v26, %v600_v47  ;;  %v773_v47 = vld [vmem:[%s1565_s4 + $0x78] sm:$0xff] }
 0x104   :  { %v636_v50 = vmax.f32 %v620_v48, 0.0 }
 0x106   :  { %1003 = vmatmul.msk.f32.gmra.mxu0 %vm644_vm2, %v636_v50  ;;  %v771_v50 = vld [vmem:[%s1565_s4 + $0x68] sm:$0xff] }
 0x107   :  { %v430_v52 = vpop.f32.mrf.mxu2  ;;  %v573_v53 = vpop.f32.mrf.mxu3 }
 0x108   :  { %v601_v54 = vmax.f32 %v455_v51, %v573_v53  ;;  %v456_v59 = vmax.f32 %v310_v56, %v430_v52  ;;  %v293_v18 = vpop.f32.mrf.mxu1  ;;  %v820_v51 = vld [vmem:[%s1566_s5 + $0x48] sm:$0xff]  ;;  %v819_v52 = vld [vmem:[%s1566_s5 + $0x40] sm:$0xff]  ;;  %v769_v56 = vld [vmem:[%s1565_s4 + $0x58] sm:$0xff] }
 0x109   :  { %v313_v23 = vmax.f32 %v1400_v17, %v293_v18  ;;  %835 = vmatpush.msra.mxu2 %v820_v51  ;;  %v763_v18 = vld [vmem:[%s1565_s4 + $0x28] sm:$0xff] }
 0x10a   :  { %v621_v10 = vadd.f32 %v1411_v26, %v601_v54  ;;  %v770_v54 = vld [vmem:[%s1565_s4 + $0x60] sm:$0xff] }
 0x10b   :  { %836 = vmatpush.msra.mxu2 %v819_v52 }
 0x10c   :  { %v637_v57 = vmax.f32 %v621_v10, 0.0  ;;  %v818_v10 = vld [vmem:[%s1566_s5 + $0x38] sm:$0xff] }
 0x10d   :  { %837 = vmatpush.msra.mxu2 %v818_v10 }
 0x10e   :  { %1004 = vmatmul.msk.f32.gmra.mxu0 %vm644_vm2, %v637_v57  ;;  %v817_v57 = vld [vmem:[%s1566_s5 + $0x30] sm:$0xff] }
 0x10f   :  { %v433_v60 = vpop.f32.mrf.mxu2  ;;  %v576_v61 = vpop.f32.mrf.mxu3  ;;  %838 = vmatpush.msra.mxu2 %v817_v57 }
 0x110   :  { %v602_v1 = vmax.f32 %v456_v59, %v576_v61  ;;  %v457_v7 = vmax.f32 %v311_v2, %v433_v60  ;;  %v296_v28 = vpop.f32.mrf.mxu1  ;;  %v768_v60 = vld [vmem:[%s1565_s4 + $0x50] sm:$0xff]  ;;  %v816_v61 = vld [vmem:[%s1566_s5 + $0x28] sm:$0xff]  ;;  %v815_v2 = vld [vmem:[%s1566_s5 + $0x20] sm:$0xff] }
 0x111   :  { %v314_v30 = vmax.f32 %v1406_v21, %v296_v28  ;;  %839 = vmatpush.msra.mxu2 %v816_v61  ;;  %v758_v28 = vld [vmem:[%s1565_s4] sm:$0xff] }
 0x112   :  { %v622_v16 = vadd.f32 %v1411_v26, %v602_v1 }
 0x113   :  { %840 = vmatpush.msra.mxu2 %v815_v2 }
 0x114   :  { %v638_v3 = vmax.f32 %v622_v16, 0.0  ;;  %v767_v16 = vld [vmem:[%s1565_s4 + $0x48] sm:$0xff] }
 0x116   :  { %1005 = vmatmul.msk.f32.gmra.mxu0 %vm644_vm2, %v638_v3 }
 0x117   :  { %v436_v8 = vpop.f32.mrf.mxu2  ;;  %v579_v9 = vpop.f32.mrf.mxu3 }
 0x118   :  { %v603_v12 = vmax.f32 %v457_v7, %v579_v9  ;;  %v458_v15 = vmax.f32 %v312_v13, %v436_v8  ;;  %v814_v7 = vld [vmem:[%s1566_s5 + $0x18] sm:$0xff]  ;;  %v764_v13 = vld [vmem:[%s1565_s4 + $0x30] sm:$0xff] }
 0x119   :  { %v765_v9 = vld [vmem:[%s1565_s4 + $0x38] sm:$0xff]  ;;  %841 = vmatpush.msra.mxu2 %v814_v7 }
 0x11a   :  { %v623_v63 = vadd.f32 %v1411_v26, %v603_v12  ;;  %v813_v12 = vld [vmem:[%s1566_s5 + $0x10] sm:$0xff] }
 0x11b   :  { %842 = vmatpush.msra.mxu2 %v813_v12 }
 0x11c   :  { %v639_v14 = vmax.f32 %v623_v63, 0.0 }
 0x11e   :  { %1006 = vmatmul.msk.f32.gmra.mxu0 %vm644_vm2, %v639_v14  ;;  %v812_v14 = vld [vmem:[%s1566_s5 + $0x8] sm:$0xff] }
 0x11f   :  { %v582_v19 = vpop.f32.mrf.mxu3  ;;  %v439_v5 = vpop.f32.mrf.mxu2  ;;  %843 = vmatpush.msra.mxu2 %v812_v14 }
 0x120   :  { %v604_v20 = vmax.f32 %v458_v15, %v582_v19  ;;  %v459_v25 = vmax.f32 %v313_v23, %v439_v5 }
 0x122   :  { %v624_v22 = vadd.f32 %v1411_v26, %v604_v20  ;;  %v762_v20 = vld [vmem:[%s1565_s4 + $0x20] sm:$0xff] }
 0x124   :  { %v640_v24 = vmax.f32 %v624_v22, 0.0  ;;  %v761_v22 = vld [vmem:[%s1565_s4 + $0x18] sm:$0xff] }
 0x126   :  { %1007 = vmatmul.msk.f32.gmra.mxu0 %vm644_vm2, %v640_v24  ;;  %v760_v24 = vld [vmem:[%s1565_s4 + $0x10] sm:$0xff] }
 0x127   :  { %v585_v27 = vpop.f32.mrf.mxu3  ;;  %v442_v29 = vpop.f32.mrf.mxu2 }
 0x128   :  { %v605_v58 = vmax.f32 %v459_v25, %v585_v27  ;;  %v460_v32 = vmax.f32 %v314_v30, %v442_v29  ;;  %v759_v27 = vld [vmem:[%s1565_s4 + $0x8] sm:$0xff]  ;;  %v790_v30 = vld [vmem:[%s1567_s6] sm:$0x3] }
 0x12a   :  { %v625_v11 = vadd.f32 %v1411_v26, %v605_v58 }
 0x12c   :  { %v641_v31 = vmax.f32 %v625_v11, 0.0 }
 0x12e   :  { %1008 = vmatmul.msk.f32.gmra.mxu0 %vm644_vm2, %v641_v31  ;;  %v811_v31 = vld [vmem:[%s1566_s5] sm:$0xff]  ;;  %s1059_s5 = smov [#allocation2]  }
 0x12f   :  { %v588_v33 = vpop.f32.mrf.mxu3  ;;  %844 = vmatpush.msra.mxu2 %v811_v31  ;;  %s867_s6 = sshll.u32 %s1059_s5, 4  ;;  %s868_s6 = int_to_ptr.vmem [resolvable:$true] %s867_s6 }
 0x130   :  { %v606_v34 = vmax.f32 %v460_v32, %v588_v33  ;;  %v1028_v33 = vld [vmem:[%s1568_s7] ss:$0 sm:$0xff] }
 0x132   :  { %v626_v17 = vadd.f32 %v1411_v26, %v606_v34 }
 0x134   :  { %v642_v0 = vmax.f32 %v626_v17, 0.0 }
 0x136   :  { %1009 = vmatmul.msk.f32.gmra.mxu0 %vm644_vm2, %v642_v0 }
 0x13b   :  { %v1456_v35 = vpop.f32.mrf.mxu0 }
 0x13c   :  { %v774_v29 = vmul.f32 %v758_v28, %v1456_v35 }
 0x143   :  { %v1458_v36 = vpop.f32.mrf.mxu0 }
 0x144   :  { %v775_v11 = vmul.f32 %v759_v27, %v1458_v36 }
 0x14b   :  { %v1460_v37 = vpop.f32.mrf.mxu0 }
 0x14c   :  { %v776_v58 = vmul.f32 %v760_v24, %v1460_v37 }
 0x153   :  { %v1462_v38 = vpop.f32.mrf.mxu0 }
 0x154   :  { %v777_v25 = vmul.f32 %v761_v22, %v1462_v38 }
 0x15b   :  { %v1464_v21 = vpop.f32.mrf.mxu0 }
 0x15c   :  { %v778_v23 = vmul.f32 %v762_v20, %v1464_v21 }
 0x163   :  { %v725_v39 = vpop.f32.mrf.mxu0 }
 0x164   :  { %v779_v5 = vmul.f32 %v763_v18, %v725_v39 }
 0x16b   :  { %v728_v40 = vpop.f32.mrf.mxu0 }
 0x16c   :  { %v780_v19 = vmul.f32 %v764_v13, %v728_v40 }
 0x173   :  { %v731_v62 = vpop.f32.mrf.mxu0 }
 0x174   :  { %v781_v15 = vmul.f32 %v765_v9, %v731_v62 }
 0x17b   :  { %v734_v41 = vpop.f32.mrf.mxu0 }
 0x17c   :  { %v782_v63 = vmul.f32 %v766_v6, %v734_v41 }
 0x183   :  { %v737_v42 = vpop.f32.mrf.mxu0 }
 0x184   :  { %v783_v8 = vmul.f32 %v767_v16, %v737_v42 }
 0x18b   :  { %v740_v43 = vpop.f32.mrf.mxu0 }
 0x18c   :  { %v784_v3 = vmul.f32 %v768_v60, %v740_v43 }
 0x193   :  { %v743_v26 = vpop.f32.mrf.mxu0 }
 0x194   :  { %v785_v1 = vmul.f32 %v769_v56, %v743_v26 }
 0x19b   :  { %v746_v44 = vpop.f32.mrf.mxu0 }
 0x19c   :  { %v786_v59 = vmul.f32 %v770_v54, %v746_v44 }
 0x1a3   :  { %v749_v45 = vpop.f32.mrf.mxu0 }
 0x1a4   :  { %v787_v55 = vmul.f32 %v771_v50, %v749_v45 }
 0x1ab   :  { %v752_v46 = vpop.f32.mrf.mxu0 }
 0x1ac   :  { %v788_v53 = vmul.f32 %v772_v4, %v752_v46 }
 0x1b3   :  { %v755_v48 = vpop.f32.mrf.mxu0 }
 0x1b4   :  { %v789_v49 = vmul.f32 %v773_v47, %v755_v48 }
 0x1b6   :  { %791 = vmatpush.msra.mxu1 %v789_v49 }
 0x1b8   :  { %792 = vmatpush.msra.mxu1 %v788_v53 }
 0x1ba   :  { %793 = vmatpush.msra.mxu1 %v787_v55 }
 0x1bc   :  { %794 = vmatpush.msra.mxu1 %v786_v59 }
 0x1be   :  { %795 = vmatpush.msra.mxu1 %v785_v1 }
 0x1c0   :  { %796 = vmatpush.msra.mxu1 %v784_v3 }
 0x1c2   :  { %797 = vmatpush.msra.mxu1 %v783_v8 }
 0x1c4   :  { %798 = vmatpush.msra.mxu1 %v782_v63 }
 0x1c6   :  { %799 = vmatpush.msra.mxu1 %v781_v15 }
 0x1c8   :  { %800 = vmatpush.msra.mxu1 %v780_v19 }
 0x1ca   :  { %801 = vmatpush.msra.mxu1 %v779_v5 }
 0x1cc   :  { %802 = vmatpush.msra.mxu1 %v778_v23 }
 0x1ce   :  { %803 = vmatpush.msra.mxu1 %v777_v25 }
 0x1d0   :  { %804 = vmatpush.msra.mxu1 %v776_v58 }
 0x1d2   :  { %805 = vmatpush.msra.mxu1 %v775_v11 }
 0x1d4   :  { %806 = vmatpush.msra.mxu1 %v774_v29 }
 0x1d5   :  { %807 = vmatmul.f32.vlgmr.msra.gmra.mxu1 %v790_v30 }
 0x252   :  { %v808_v32 = vpop.f32.mrf.mxu1 }
 0x253   :  { %1010 = vmatmul.msk.f32.vlgmr.msra.gmra.mxu2 %vm825_vm3, %v808_v32 }
 0x2d6   :  { %v846_v34 = vpop.f32.mrf.mxu2 }
 0x2d7   :  { %v847_v17 = vadd.f32 %v1028_v33, %v846_v34 }
 0x2d9   :  { %v850_v0 = vsel %vm849_vm4, %v847_v17, -inf }
 0x2da   :  { %851 = vmax.xlane.f32.xlu0 %v850_v0 }
 0x34d   :  { %v852_v35 = vpop.xlane.xlu0 %851 }
 0x34e   :  { %v853_v36 = vsub.f32 %v847_v17, %v852_v35 }
 0x350   :  { %v854_v37 = vmul.f32 1.442695, %v853_v36 }
 0x352   :  { %1029 = vpow2.f32 %v854_v37 }
 0x358   :  { %v1030_v38 = vpop.eup %1029 }
 0x359   :  { %v856_v21 = vsel %vm849_vm4, %v1030_v38, 0.0 }
 0x35a   :  { %857 = vadd.xlane.f32.xlu0 %v856_v21 }
 0x3cd   :  { %v858_v39 = vpop.xlane.xlu0 %857 }
 0x3ce   :  { %1031 = vrcp.f32 %v858_v39 }
 0x3d4   :  { %v1032_v40 = vpop.eup %1031 }
 0x3d5   :  { %v860_v62 = vmul.f32 %v1032_v40, %v1030_v38 }
 0x3d7   :  { %861 = vst.msk [vmem:[#allocation2] sm:$0x3] %vm849_vm4, %v860_v62 }
 0x3d8   :  { %872 = dma.vmem_to_hbm [thread:$0]  %s868_s6, 32, %s870_s10, [#allocation3]  }
 0x3d9   :  { %1057 = dma.done.wait [#allocation3], 32  }
 0x3da   :  { %1058 = vsyncadd [#allocation3], 4294967264 }
 0x3db   :  { %877 = vsyncpa [#allocation3], 1 }

</bundles_post_ra>
